<compile_context>
chip_gen: v6e
topology: v6e:2x2x1
jax: 0.10.0
libtpu: 0.0.40
codegen_flags: <defaults>
</compile_context>

<pallas_src>
import math
import jax
import jax.numpy as jnp
from jax.experimental import pallas as pl
from jax.experimental.pallas import tpu as pltpu

EPS = 1e-5  # nn.LayerNorm default


def _round_up(x, m):
    return ((x + m - 1) // m) * m


def _patch_embed_kernel(p_ref, w_ref, b_ref, g_ref, beta_ref, o_ref):
    # Conv-as-matmul on the MXU (f32 accumulation) + bias.
    x = jnp.dot(p_ref[...], w_ref[...], preferred_element_type=jnp.float32)
    x = x + b_ref[...]
    # Fused LayerNorm over embed_dim, one-pass statistics.
    inv_n = 1.0 / x.shape[-1]
    s1 = jnp.sum(x, axis=-1, keepdims=True)
    s2 = jnp.sum(x * x, axis=-1, keepdims=True)
    mu = s1 * inv_n
    var = jnp.maximum(s2 * inv_n - mu * mu, 0.0)   # clamp: rounding / garbage rows
    xn = (x - mu) * jax.lax.rsqrt(var + EPS)
    o_ref[...] = (xn * g_ref[...] + beta_ref[...]).astype(o_ref.dtype)


def _vmem_estimate(tm, K, N, in_bytes, out_bytes):
    return (2 * tm * K * in_bytes      # patches tile, double-buffered
            + 2 * tm * N * out_bytes   # output tile, double-buffered
            + 2 * K * N * in_bytes     # resident weight (+ spare buffer)
            + 6 * N * 4                # bias / gamma / beta
            + 4 * tm * N * 4)          # f32 matmul result + LN temporaries (est.)


def overlap_patch_embed(x, w, b, gamma, beta, *, patch_size=7, stride=4,
                        block_m=2048, compute_dtype=jnp.bfloat16,
                        out_dtype=jnp.float32):
    """x: (B, C, H, W) f32; w: (embed_dim, C, kh, kw); b/gamma/beta: (embed_dim,).

    Returns (y, H_out, W_out) with y of shape (B, H_out*W_out, embed_dim).
    `compute_dtype` is the streaming dtype for patches/weights (bf16 default,
    f32 accumulation either way); `out_dtype` is the output storage dtype.
    """
    B, C, H, W = x.shape
    N = w.shape[0]
    kh = kw = patch_size
    pad = patch_size // 2
    H_out = (H + 2 * pad - kh) // stride + 1
    W_out = (W + 2 * pad - kw) // stride + 1
    K = C * kh * kw
    M = B * H_out * W_out

    cdt = jnp.dtype(compute_dtype) if compute_dtype is not None else x.dtype

    # ---- XLA glue: im2col built directly in final (M, K) layout, in the
    # streaming dtype so the expanded tensor's write + re-read is halved.
    xc = x.astype(cdt)
    xp = jnp.pad(xc, ((0, 0), (0, 0), (pad, pad), (pad, pad)))
    x_nhwc = jnp.transpose(xp, (0, 2, 3, 1))      # transpose only the small input
    views = []
    for i in range(kh):
        for j in range(kw):
            views.append(
                jax.lax.slice(
                    x_nhwc,
                    (0, i, j, 0),
                    (B, i + (H_out - 1) * stride + 1,
                     j + (W_out - 1) * stride + 1, C),
                    (1, stride, stride, 1),
                )
            )
    patches = jnp.concatenate(views, axis=-1).reshape(M, K)   # (M, K), final layout

    # PyTorch conv weight (out, C, kh, kw) -> (kh, kw, C, out) -> (K, N),
    # matching the (kh, kw, C) column order of `patches`.
    w_mat = jnp.transpose(w, (2, 3, 1, 0)).reshape(K, N).astype(cdt)

    # ---- M tile size from the VMEM budget (safe on v5e/v6e/v7x) ----
    in_bytes = jnp.dtype(cdt).itemsize
    out_bytes = jnp.dtype(out_dtype).itemsize
    VMEM_BUDGET = 20 << 20

    tm = min(_round_up(block_m, 8), _round_up(M, 8))
    while tm > 512 and _vmem_estimate(tm, K, N, in_bytes, out_bytes) > VMEM_BUDGET:
        tm = _round_up(tm // 2, 8)
    if M > 1024 and pl.cdiv(M, tm) < 2:
        tm = _round_up(pl.cdiv(M, 2), 8)   # >= 2 steps so v7x megacore has work
    grid_m = pl.cdiv(M, tm)

    est = _vmem_estimate(tm, K, N, in_bytes, out_bytes)
    vmem_limit = (32 << 20) if est > (12 << 20) else None

    # ---- hot path: M-tiled Pallas call (streamed patches, resident weights) ----
    out = pl.pallas_call(
        _patch_embed_kernel,
        out_shape=jax.ShapeDtypeStruct((M, N), out_dtype),
        grid=(grid_m,),
        in_specs=[
            pl.BlockSpec((tm, K), lambda i: (i, 0)),   # streamed / double-buffered
            pl.BlockSpec((K, N), lambda i: (0, 0)),    # resident across M tiles
            pl.BlockSpec((1, N), lambda i: (0, 0)),
            pl.BlockSpec((1, N), lambda i: (0, 0)),
            pl.BlockSpec((1, N), lambda i: (0, 0)),
        ],
        out_specs=pl.BlockSpec((tm, N), lambda i: (i, 0)),
        compiler_params=pltpu.CompilerParams(
            dimension_semantics=("parallel",),         # megacore split on v7x
            vmem_limit_bytes=vmem_limit,
        ),
    )(
        patches,
        w_mat,
        b.reshape(1, N).astype(jnp.float32),
        gamma.reshape(1, N).astype(jnp.float32),
        beta.reshape(1, N).astype(jnp.float32),
    )

    return out.reshape(B, H_out * W_out, N), H_out, W_out


def _reference(x, w, b, gamma, beta, *, patch_size=7, stride=4):
    """Pure-JAX reference mirroring the PyTorch forward (LayerNorm branch)."""
    pad = patch_size // 2
    y = jax.lax.conv_general_dilated(
        x, w, window_strides=(stride, stride),
        padding=((pad, pad), (pad, pad)),
        dimension_numbers=("NCHW", "OIHW", "NCHW"),
    ) + b[None, :, None, None]
    B, Cout, Ho, Wo = y.shape
    y = y.reshape(B, Cout, Ho * Wo).transpose(0, 2, 1)  # (B, HW, C)
    mu = jnp.mean(y, axis=-1, keepdims=True)
    var = jnp.mean((y - mu) ** 2, axis=-1, keepdims=True)
    yn = (y - mu) / jnp.sqrt(var + EPS)
    return yn * gamma + beta, Ho, Wo


if __name__ == "__main__":
    # Small shapes consistent with the module's forward.
    B, C, IMG = 2, 4, 16
    EMBED, PATCH, STRIDE = 32, 7, 4

    key = jax.random.PRNGKey(0)
    kx, kw_key = jax.random.split(key)

    x = jax.random.normal(kx, (B, C, IMG, IMG), dtype=jnp.float32)

    # Deterministic init matching _init_weights for Conv2d / LayerNorm.
    fan_out = PATCH * PATCH * EMBED
    w = jax.random.normal(kw_key, (EMBED, C, PATCH, PATCH), dtype=jnp.float32) * math.sqrt(2.0 / fan_out)
    b = jnp.zeros((EMBED,), dtype=jnp.float32)
    gamma = jnp.ones((EMBED,), dtype=jnp.float32)
    beta = jnp.zeros((EMBED,), dtype=jnp.float32)

    y_ref, H_ref, W_ref = _reference(x, w, b, gamma, beta, patch_size=PATCH, stride=STRIDE)

    # f32 streaming path: tight tolerance against the reference.
    y32, H_out, W_out = overlap_patch_embed(x, w, b, gamma, beta, patch_size=PATCH,
                                            stride=STRIDE, compute_dtype=jnp.float32)
    y32 = jax.block_until_ready(y32)
    assert (H_out, W_out) == (H_ref, W_ref)
    assert y32.shape == (B, H_out * W_out, EMBED)
    assert jnp.max(jnp.abs(y32 - y_ref)) < 1e-4

    # Default bf16-streamed path (f32 accumulation + f32 LayerNorm), looser tol.
    y16, _, _ = overlap_patch_embed(x, w, b, gamma, beta, patch_size=PATCH, stride=STRIDE)
    y16 = jax.block_until_ready(y16)
    assert jnp.max(jnp.abs(y16 - y_ref)) < 0.1

    # Small tile to exercise the multi-step pipelined grid path (grid = 4).
    y2, _, _ = overlap_patch_embed(x, w, b, gamma, beta, patch_size=PATCH, stride=STRIDE, block_m=8)
    y2 = jax.block_until_ready(y2)
    assert jnp.max(jnp.abs(y2 - y_ref)) < 0.1

    print("KERNEL_OK")
</pallas_src>

<mosaic_0001>
module attributes {stable_mosaic.version = 11 : i64} {
  func.func @_patch_embed_kernel(%arg0: i32, %arg1: memref<32x196xf32, #tpu.memory_space<vmem>>, %arg2: memref<196x32xf32, #tpu.memory_space<vmem>>, %arg3: memref<1x32xf32, #tpu.memory_space<vmem>>, %arg4: memref<1x32xf32, #tpu.memory_space<vmem>>, %arg5: memref<1x32xf32, #tpu.memory_space<vmem>>, %arg6: memref<32x32xf32, #tpu.memory_space<vmem>>) attributes {dimension_semantics = [#tpu.dimension_semantics<parallel>], iteration_bounds = array<i64: 1>, scalar_prefetch = 0 : i64, scratch_operands = 0 : i64, tpu.core_type = #tpu.core_type<tc>, window_params = [{transform_indices = @transform_0, window_bounds = array<i64: 32, 196>}, {pipeline_mode = #tpu.pipeline_mode<synchronous>, transform_indices = @transform_1, window_bounds = array<i64: 196, 32>}, {pipeline_mode = #tpu.pipeline_mode<synchronous>, transform_indices = @transform_2, window_bounds = array<i64: 1, 32>}, {pipeline_mode = #tpu.pipeline_mode<synchronous>, transform_indices = @transform_3, window_bounds = array<i64: 1, 32>}, {pipeline_mode = #tpu.pipeline_mode<synchronous>, transform_indices = @transform_4, window_bounds = array<i64: 1, 32>}, {transform_indices = @transform_5, window_bounds = array<i64: 32, 32>}]} {
    %c0 = arith.constant 0 : index
    %c0_0 = arith.constant 0 : index
    %0 = vector.load %arg1[%c0, %c0_0] : memref<32x196xf32, #tpu.memory_space<vmem>>, vector<32x196xf32>
    %c0_1 = arith.constant 0 : index
    %c0_2 = arith.constant 0 : index
    %1 = vector.load %arg2[%c0_1, %c0_2] : memref<196x32xf32, #tpu.memory_space<vmem>>, vector<196x32xf32>
    %cst = arith.constant dense<0.000000e+00> : vector<32x32xf32>
    %2 = tpu.matmul %0, %1, %cst {dimension_numbers = #tpu.dot_dimension_numbers<[1], [0], [0], [1], [0, 0, 1, 1], [], []>} : vector<32x196xf32>, vector<196x32xf32>, vector<32x32xf32> -> vector<32x32xf32>
    %c0_3 = arith.constant 0 : index
    %c0_4 = arith.constant 0 : index
    %3 = vector.load %arg3[%c0_3, %c0_4] : memref<1x32xf32, #tpu.memory_space<vmem>>, vector<1x32xf32>
    %4 = vector.broadcast %3 : vector<1x32xf32> to vector<32x32xf32>
    %5 = arith.addf %2, %4 : vector<32x32xf32>
    %cst_5 = arith.constant dense<0.000000e+00> : vector<32xf32>
    %6 = vector.multi_reduction <add>, %5, %cst_5 [1] : vector<32x32xf32> to vector<32xf32>
    %7 = vector.shape_cast %6 : vector<32xf32> to vector<32x1xf32>
    %8 = arith.mulf %5, %5 : vector<32x32xf32>
    %cst_6 = arith.constant dense<0.000000e+00> : vector<32xf32>
    %9 = vector.multi_reduction <add>, %8, %cst_6 [1] : vector<32x32xf32> to vector<32xf32>
    %10 = vector.shape_cast %9 : vector<32xf32> to vector<32x1xf32>
    %cst_7 = arith.constant 3.125000e-02 : f32
    %11 = vector.broadcast %cst_7 : f32 to vector<32x1xf32>
    %12 = arith.mulf %7, %11 : vector<32x1xf32>
    %cst_8 = arith.constant 3.125000e-02 : f32
    %13 = vector.broadcast %cst_8 : f32 to vector<32x1xf32>
    %14 = arith.mulf %10, %13 : vector<32x1xf32>
    %15 = arith.mulf %12, %12 : vector<32x1xf32>
    %16 = arith.subf %14, %15 : vector<32x1xf32>
    %cst_9 = arith.constant 0.000000e+00 : f32
    %17 = vector.broadcast %cst_9 : f32 to vector<32x1xf32>
    %18 = arith.maximumf %16, %17 : vector<32x1xf32>
    %19 = vector.broadcast %12 : vector<32x1xf32> to vector<32x32xf32>
    %20 = arith.subf %5, %19 : vector<32x32xf32>
    %cst_10 = arith.constant 9.99999974E-6 : f32
    %21 = vector.broadcast %cst_10 : f32 to vector<32x1xf32>
    %22 = arith.addf %18, %21 : vector<32x1xf32>
    %23 = math.rsqrt %22 : vector<32x1xf32>
    %24 = vector.broadcast %23 : vector<32x1xf32> to vector<32x32xf32>
    %25 = arith.mulf %20, %24 : vector<32x32xf32>
    %c0_11 = arith.constant 0 : index
    %c0_12 = arith.constant 0 : index
    %26 = vector.load %arg4[%c0_11, %c0_12] : memref<1x32xf32, #tpu.memory_space<vmem>>, vector<1x32xf32>
    %27 = vector.broadcast %26 : vector<1x32xf32> to vector<32x32xf32>
    %28 = arith.mulf %25, %27 : vector<32x32xf32>
    %c0_13 = arith.constant 0 : index
    %c0_14 = arith.constant 0 : index
    %29 = vector.load %arg5[%c0_13, %c0_14] : memref<1x32xf32, #tpu.memory_space<vmem>>, vector<1x32xf32>
    %30 = vector.broadcast %29 : vector<1x32xf32> to vector<32x32xf32>
    %31 = arith.addf %28, %30 : vector<32x32xf32>
    %c0_15 = arith.constant 0 : index
    %c0_16 = arith.constant 0 : index
    %32 = vector.load %arg6[%c0_15, %c0_16] : memref<32x32xf32, #tpu.memory_space<vmem>>, vector<32x32xf32>
    tpu.vector_store %arg6[%c0_15, %c0_16], %31 {strides = array<i32>} : memref<32x32xf32, #tpu.memory_space<vmem>>, vector<32x32xf32>,
    return
  }
  func.func @transform_0(%arg0: i32) -> (i32, i32) {
    %c0_i32 = arith.constant 0 : i32
    %c0_i32_0 = arith.constant 0 : i32
    return %arg0, %c0_i32 : i32, i32
  }
  func.func @transform_1(%arg0: i32) -> (i32, i32) {
    %c0_i32 = arith.constant 0 : i32
    %c0_i32_0 = arith.constant 0 : i32
    %c0_i32_1 = arith.constant 0 : i32
    return %c0_i32, %c0_i32_0 : i32, i32
  }
  func.func @transform_2(%arg0: i32) -> (i32, i32) {
    %c0_i32 = arith.constant 0 : i32
    %c0_i32_0 = arith.constant 0 : i32
    %c0_i32_1 = arith.constant 0 : i32
    return %c0_i32, %c0_i32_0 : i32, i32
  }
  func.func @transform_3(%arg0: i32) -> (i32, i32) {
    %c0_i32 = arith.constant 0 : i32
    %c0_i32_0 = arith.constant 0 : i32
    %c0_i32_1 = arith.constant 0 : i32
    return %c0_i32, %c0_i32_0 : i32, i32
  }
  func.func @transform_4(%arg0: i32) -> (i32, i32) {
    %c0_i32 = arith.constant 0 : i32
    %c0_i32_0 = arith.constant 0 : i32
    %c0_i32_1 = arith.constant 0 : i32
    return %c0_i32, %c0_i32_0 : i32, i32
  }
  func.func @transform_5(%arg0: i32) -> (i32, i32) {
    %c0_i32 = arith.constant 0 : i32
    %c0_i32_0 = arith.constant 0 : i32
    return %arg0, %c0_i32 : i32, i32
  }
}

</mosaic_0001>

<bundles_post_ra>
// kernel: tpu_custom_call.1
= control target key start
LH: loop header
LB: loop body
LE: loop exit
PB: predicated region body
PF: predicated region fallthrough
CT: control target
= control target key end

     0   :  { %v362_v1 = vmov 0.0   ;;  %s593_s0 = inlined_call_operand.vmem [shape: f32[32,196], index: 0, kind: input, shape index: {}]   ;;  %s594_s1 = inlined_call_operand.vmem [shape: f32[196,32], index: 1, kind: input, shape index: {}]   ;;  %s595_s2 = inlined_call_operand.vmem [shape: f32[1,32], index: 2, kind: input, shape index: {}]   ;;  %s596_s3 = inlined_call_operand.vmem [shape: f32[1,32], index: 3, kind: input, shape index: {}]   ;;  %s597_s4 = inlined_call_operand.vmem [shape: f32[1,32], index: 4, kind: input, shape index: {}]   ;;  %s598_s5 = inlined_call_operand.hbm [shape: f32[32,32], index: 5, kind: output, shape index: {}]  }
   0x1   :  { %v44_v0 = vld [vmem:[%s594_s1 + $0x78] sm:$0xff]  ;;  %78 = vmatprep.subr.mxu0 %v362_v1  ;;  %278 = vmatprep.subr.mxu1 %v362_v1  ;;  %v43_v2 = vld [vmem:[%s594_s1 + $0x70] sm:$0xff]  ;;  %v42_v3 = vld [vmem:[%s594_s1 + $0x68] sm:$0xff] }
   0x2   :  { %79 = vmatpush1.msra.mxu0 %v44_v0  ;;  %303 = vmatpush1.msra.mxu1 %v44_v0  ;;  %v41_v4 = vld [vmem:[%s594_s1 + $0x60] sm:$0xff]  ;;  %v40_v5 = vld [vmem:[%s594_s1 + $0x58] sm:$0xff]  ;;  %v39_v6 = vld [vmem:[%s594_s1 + $0x50] sm:$0xff] }
   0x3   :  { %80 = vmatprep.subr.mxu0 %v362_v1  ;;  %279 = vmatprep.subr.mxu1 %v362_v1  ;;  %v38_v7 = vld [vmem:[%s594_s1 + $0x48] sm:$0xff] }
   0x4   :  { %81 = vmatpush1.msra.mxu0 %v43_v2  ;;  %304 = vmatpush1.msra.mxu1 %v43_v2 }
   0x5   :  { %82 = vmatprep.subr.mxu0 %v362_v1  ;;  %280 = vmatprep.subr.mxu1 %v362_v1 }
   0x6   :  { %83 = vmatpush1.msra.mxu0 %v42_v3  ;;  %305 = vmatpush1.msra.mxu1 %v42_v3 }
   0x7   :  { %84 = vmatprep.subr.mxu0 %v362_v1  ;;  %281 = vmatprep.subr.mxu1 %v362_v1 }
   0x8   :  { %85 = vmatpush1.msra.mxu0 %v41_v4  ;;  %306 = vmatpush1.msra.mxu1 %v41_v4 }
   0x9   :  { %86 = vmatprep.subr.mxu0 %v362_v1  ;;  %282 = vmatprep.subr.mxu1 %v362_v1 }
   0xa   :  { %87 = vmatpush1.msra.mxu0 %v40_v5  ;;  %307 = vmatpush1.msra.mxu1 %v40_v5 }
   0xb   :  { %88 = vmatprep.subr.mxu0 %v362_v1  ;;  %283 = vmatprep.subr.mxu1 %v362_v1 }
   0xc   :  { %10 = vsyncpa [#allocation3], 0  ;;  %89 = vmatpush1.msra.mxu0 %v39_v6  ;;  %308 = vmatpush1.msra.mxu1 %v39_v6  ;;  %v37_v8 = vld [vmem:[%s594_s1 + $0x40] sm:$0xff]  ;;  %v36_v9 = vld [vmem:[%s594_s1 + $0x38] sm:$0xff]  ;;  %vm74_vm0 = vcmask 1043456   ;;  %vm61_vm1 = vcmask 556032  }
   0xd   :  { %90 = vmatprep.subr.mxu0 %v362_v1  ;;  %284 = vmatprep.subr.mxu1 %v362_v1  ;;  %v35_v10 = vld [vmem:[%s594_s1 + $0x30] sm:$0xff]  ;;  %v34_v11 = vld [vmem:[%s594_s1 + $0x28] sm:$0xff]  ;;  %v33_v12 = vld [vmem:[%s594_s1 + $0x20] sm:$0xff]  ;;  %vm163_vm2 = vcmask 261120  }
   0xe   :  { %91 = vmatpush1.msra.mxu0 %v38_v7  ;;  %309 = vmatpush1.msra.mxu1 %v38_v7  ;;  %v32_v13 = vld [vmem:[%s594_s1 + $0x18] sm:$0xff]  ;;  %v31_v14 = vld [vmem:[%s594_s1 + $0x10] sm:$0xff]  ;;  %v30_v15 = vld [vmem:[%s594_s1 + $0x8] sm:$0xff] }
   0xf   :  { %92 = vmatprep.subr.mxu0 %v362_v1  ;;  %285 = vmatprep.subr.mxu1 %v362_v1  ;;  %v29_v16 = vld [vmem:[%s594_s1] sm:$0xff]  ;;  %v52_v18 = vld [vmem:[%s594_s1 + $0xb8] sm:$0xff]  ;;  %v51_v19 = vld [vmem:[%s594_s1 + $0xb0] sm:$0xff] }
  0x10   :  { %93 = vmatpush1.msra.mxu0 %v37_v8  ;;  %310 = vmatpush1.msra.mxu1 %v37_v8  ;;  %v53_v17 = vld [vmem:[%s594_s1 + $0xc0] sm:$0xf]  ;;  %v50_v20 = vld [vmem:[%s594_s1 + $0xa8] sm:$0xff]  ;;  %v48_v22 = vld [vmem:[%s594_s1 + $0x98] sm:$0xff] }
  0x11   :  { %94 = vmatprep.subr.mxu0 %v362_v1  ;;  %286 = vmatprep.subr.mxu1 %v362_v1  ;;  %v49_v21 = vld [vmem:[%s594_s1 + $0xa0] sm:$0xff]  ;;  %v47_v23 = vld [vmem:[%s594_s1 + $0x90] sm:$0xff]  ;;  %v46_v24 = vld [vmem:[%s594_s1 + $0x88] sm:$0xff] }
  0x12   :  { %95 = vmatpush1.msra.mxu0 %v36_v9  ;;  %311 = vmatpush1.msra.mxu1 %v36_v9  ;;  %v45_v25 = vld [vmem:[%s594_s1 + $0x80] sm:$0xff]  ;;  %v22_v26 = vld [vmem:[%s593_s0 + $0x8] sm:$0xff]  ;;  %v24_v30 = vld [vmem:[%s593_s0 + $0x18] sm:$0xff] }
  0x13   :  { %96 = vmatprep.subr.mxu0 %v362_v1  ;;  %287 = vmatprep.subr.mxu1 %v362_v1  ;;  %v26_v27 = vld [vmem:[%s593_s0 + $0x28] sm:$0xff]  ;;  %v21_v28 = vld [vmem:[%s593_s0] sm:$0xff]  ;;  %v28_v31 = vld [vmem:[%s593_s0 + $0x38] sm:$0xff] }
  0x14   :  { %97 = vmatpush1.msra.mxu0 %v35_v10  ;;  %312 = vmatpush1.msra.mxu1 %v35_v10  ;;  %v25_v29 = vld [vmem:[%s593_s0 + $0x20] sm:$0xff]  ;;  %v23_v32 = vld [vmem:[%s593_s0 + $0x10] sm:$0xff] }
  0x15   :  { %98 = vmatprep.subr.mxu0 %v362_v1  ;;  %288 = vmatprep.subr.mxu1 %v362_v1  ;;  %v27_v33 = vld [vmem:[%s593_s0 + $0x30] sm:$0xff]  ;;  %v270_v34 = vld [vmem:[%s595_s2] ss:$0 sm:$0xff] }
  0x16   :  { %99 = vmatpush1.msra.mxu0 %v34_v11  ;;  %313 = vmatpush1.msra.mxu1 %v34_v11 }
  0x17   :  { %100 = vmatprep.subr.mxu0 %v362_v1  ;;  %289 = vmatprep.subr.mxu1 %v362_v1 }
  0x18   :  { %101 = vmatpush1.msra.mxu0 %v33_v12  ;;  %314 = vmatpush1.msra.mxu1 %v33_v12 }
  0x19   :  { %102 = vmatprep.subr.mxu0 %v362_v1  ;;  %290 = vmatprep.subr.mxu1 %v362_v1 }
  0x1a   :  { %103 = vmatpush1.msra.mxu0 %v32_v13  ;;  %315 = vmatpush1.msra.mxu1 %v32_v13 }
  0x1b   :  { %104 = vmatprep.subr.mxu0 %v362_v1  ;;  %291 = vmatprep.subr.mxu1 %v362_v1 }
  0x1c   :  { %105 = vmatpush1.msra.mxu0 %v31_v14  ;;  %316 = vmatpush1.msra.mxu1 %v31_v14 }
  0x1d   :  { %106 = vmatprep.subr.mxu0 %v362_v1  ;;  %292 = vmatprep.subr.mxu1 %v362_v1 }
  0x1e   :  { %107 = vmatpush1.msra.mxu0 %v30_v15  ;;  %317 = vmatpush1.msra.mxu1 %v30_v15 }
  0x1f   :  { %108 = vmatprep.subr.mxu0 %v362_v1  ;;  %293 = vmatprep.subr.mxu1 %v362_v1 }
  0x20   :  { %109 = vmatpush1.msra.mxu0 %v29_v16  ;;  %318 = vmatpush1.msra.mxu1 %v29_v16 }
  0x21   :  { %124 = vmatprep.subr.mxu0 %v362_v1  ;;  %294 = vmatprep.subr.mxu1 %v362_v1 }
  0x22   :  { %271 = vmatpush2.msk.msra.mxu0 %vm74_vm0, %v53_v17  ;;  %319 = vmatpush2.msk.msra.mxu1 %vm74_vm0, %v53_v17 }
  0x23   :  { %126 = vmatprep.subr.mxu0 %v362_v1  ;;  %295 = vmatprep.subr.mxu1 %v362_v1 }
  0x24   :  { %127 = vmatpush2.msra.mxu0 %v52_v18  ;;  %320 = vmatpush2.msra.mxu1 %v52_v18 }
  0x25   :  { %128 = vmatprep.subr.mxu0 %v362_v1  ;;  %296 = vmatprep.subr.mxu1 %v362_v1 }
  0x26   :  { %129 = vmatpush2.msra.mxu0 %v51_v19  ;;  %321 = vmatpush2.msra.mxu1 %v51_v19 }
  0x27   :  { %130 = vmatprep.subr.mxu0 %v362_v1  ;;  %297 = vmatprep.subr.mxu1 %v362_v1 }
  0x28   :  { %131 = vmatpush2.msra.mxu0 %v50_v20  ;;  %322 = vmatpush2.msra.mxu1 %v50_v20 }
  0x29   :  { %132 = vmatprep.subr.mxu0 %v362_v1  ;;  %298 = vmatprep.subr.mxu1 %v362_v1 }
  0x2a   :  { %133 = vmatpush2.msra.mxu0 %v49_v21  ;;  %323 = vmatpush2.msra.mxu1 %v49_v21 }
  0x2b   :  { %134 = vmatprep.subr.mxu0 %v362_v1  ;;  %299 = vmatprep.subr.mxu1 %v362_v1 }
  0x2c   :  { %135 = vmatpush2.msra.mxu0 %v48_v22  ;;  %324 = vmatpush2.msra.mxu1 %v48_v22 }
  0x2d   :  { %136 = vmatprep.subr.mxu0 %v362_v1  ;;  %300 = vmatprep.subr.mxu1 %v362_v1 }
  0x2e   :  { %137 = vmatpush2.msra.mxu0 %v47_v23  ;;  %325 = vmatpush2.msra.mxu1 %v47_v23 }
  0x2f   :  { %138 = vmatprep.subr.mxu0 %v362_v1  ;;  %301 = vmatprep.subr.mxu1 %v362_v1 }
  0x30   :  { %139 = vmatpush2.msra.mxu0 %v46_v24  ;;  %326 = vmatpush2.msra.mxu1 %v46_v24 }
  0x31   :  { %140 = vmatprep.subr.mxu0 %v362_v1  ;;  %302 = vmatprep.subr.mxu1 %v362_v1 }
  0x32   :  { %141 = vmatpush2.msra.mxu0 %v45_v25  ;;  %327 = vmatpush2.msra.mxu1 %v45_v25 }
  0x33   :  { %272 = vmatprep.mubr.msk.f32.mxu0 %vm61_vm1, %v22_v26  ;;  %274 = vmatprep.mubr.msk.f32.mxu1 %vm61_vm1, %v26_v27 }
  0x34   :  { %143 = vmatmul.mubr.f32.vlgmr.msra.gmra.mxu0 %v21_v28  ;;  %153 = vmatmul.mubr.f32.vlgmr.msra.gmra.mxu1 %v25_v29  ;;  %v276_v29 = vld [vmem:[%s596_s3] ss:$0 sm:$0xff]  ;;  %s363_s3 = smov [#allocation2]  }
  0x35   :  { %273 = vmatprep.mubr.msk.f32.mxu0 %vm61_vm1, %v24_v30  ;;  %275 = vmatprep.mubr.msk.f32.mxu1 %vm61_vm1, %v28_v31  ;;  %v277_v31 = vld [vmem:[%s597_s4] ss:$0 sm:$0xff]  ;;  %s259_s12 = sshll.u32 %s363_s3, 4  ;;  %s260_s12 = int_to_ptr.vmem [resolvable:$true] %s259_s12 }
  0x36   :  { %s340_s4 = scalar_lea.vmem %s260_s12, 512  ;;  %p345_p1 = scmp.lt.s32.totalorder %s260_s12, %s260_s12 }
  0x37   :  { %p341_p0 = scmp.ne.s32.totalorder %s260_s12, %s340_s4  ;;  %p346_p2 = scmp.lt.s32.totalorder %s340_s4, %s340_s4 }
  0x38   :  { %148 = vmatmul.mubr.f32.gmra.mxu0 %v23_v32  ;;  %158 = vmatmul.mubr.f32.gmra.mxu1 %v27_v33 }
  0x39   :  { %p347_p3 = por %p346_p2, %p345_p1 }
  0x3b   :  { %p348_p4 = pnand %p347_p3, %p341_p0 }
  0xf4   :  { %v144_v35 = vpop.f32.mrf.mxu0  ;;  %v154_v36 = vpop.f32.mrf.mxu1 }
  0xf5   :  { %v548_v37 = vadd.f32 %v270_v34, %v144_v35  ;;  %v550_v38 = vadd.f32 %v270_v34, %v154_v36 }
  0xf6   :  { %v146_v39 = vpop.f32.mrf.mxu0  ;;  %v156_v40 = vpop.f32.mrf.mxu1 }
  0xf7   :  { %v170_v41 = vsel %vm163_vm2, %v550_v38, 0.0  ;;  %v164_v42 = vsel %vm163_vm2, %v548_v37, 0.0  ;;  %v176_v43 = vmul.f32 %v548_v37, %v548_v37  ;;  %v178_v56 = vmul.f32 %v550_v38, %v550_v38 }
  0xf8   :  { %v159_v44 = vpop.f32.mrf.mxu1  ;;  %171 = vadd.xlane.f32.xlu1 %v170_v41  ;;  %v149_v45 = vpop.f32.mrf.mxu0  ;;  %165 = vadd.xlane.f32.xlu0 %v164_v42 }
  0xf9   :  { %v558_v46 = vadd.f32 %v270_v34, %v159_v44  ;;  %v560_v47 = vadd.f32 %v270_v34, %v149_v45  ;;  %v180_v51 = vsel %vm163_vm2, %v176_v43, 0.0  ;;  %v186_v58 = vsel %vm163_vm2, %v178_v56, 0.0 }
  0xfa   :  { %v151_v48 = vpop.f32.mrf.mxu0  ;;  %v161_v49 = vpop.f32.mrf.mxu1 }
  0xfb   :  { %v173_v50 = vsel %vm163_vm2, %v558_v46, 0.0  ;;  %v177_v52 = vmul.f32 %v560_v47, %v560_v47  ;;  %v167_v54 = vsel %vm163_vm2, %v560_v47, 0.0  ;;  %v179_v55 = vmul.f32 %v558_v46, %v558_v46 }
  0xfc   :  { %174 = vadd.xlane.f32.xlu1 %v173_v50  ;;  %181 = vadd.xlane.f32.xlu0 %v180_v51 }
  0xfd   :  { %v183_v53 = vsel %vm163_vm2, %v177_v52, 0.0  ;;  %v189_v57 = vsel %vm163_vm2, %v179_v55, 0.0 }
 0x100   :  { %184 = vadd.xlane.f32.xlu1 %v183_v53  ;;  %168 = vadd.xlane.f32.xlu0 %v167_v54 }
 0x104   :  { %190 = vadd.xlane.f32.xlu1 %v189_v57  ;;  %187 = vadd.xlane.f32.xlu0 %v186_v58 }
 0x181   :  { %v172_v59 = vpop.xlane.xlu1 %171  ;;  %v166_v60 = vpop.xlane.xlu0 %165 }
 0x182   :  { %v192_v61 = vmul.f32 0.03125, %v166_v60  ;;  %v194_v3 = vmul.f32 0.03125, %v172_v59 }
 0x184   :  { %v200_v0 = vmul.f32 %v192_v61, %v192_v61  ;;  %v202_v12 = vmul.f32 %v194_v3, %v194_v3  ;;  %v212_v27 = vsub.f32 %v548_v37, %v192_v61  ;;  %v214_v40 = vsub.f32 %v550_v38, %v194_v3 }
 0x185   :  { %v175_v62 = vpop.xlane.xlu1 %174  ;;  %v182_v63 = vpop.xlane.xlu0 %181 }
 0x186   :  { %v196_v1 = vmul.f32 0.03125, %v182_v63  ;;  %v195_v4 = vmul.f32 0.03125, %v175_v62 }
 0x188   :  { %v204_v2 = vsub.f32 %v196_v1, %v200_v0  ;;  %v203_v13 = vmul.f32 %v195_v4, %v195_v4  ;;  %v215_v36 = vsub.f32 %v558_v46, %v195_v4 }
 0x189   :  { %v185_v5 = vpop.xlane.xlu1 %184  ;;  %v169_v6 = vpop.xlane.xlu0 %168 }
 0x18a   :  { %v208_v7 = vmax.f32 %v204_v2, 0.0  ;;  %v193_v8 = vmul.f32 0.03125, %v169_v6  ;;  %v197_v10 = vmul.f32 0.03125, %v185_v5 }
 0x18c   :  { %v216_v9 = vadd.f32 1e-05, %v208_v7  ;;  %v201_v11 = vmul.f32 %v193_v8, %v193_v8  ;;  %v213_v34 = vsub.f32 %v560_v47, %v193_v8 }
 0x18d   :  { %v191_v14 = vpop.xlane.xlu1 %190  ;;  %v188_v15 = vpop.xlane.xlu0 %187 }
 0x18e   :  { %332 = vrsqrt.f32 %v216_v9  ;;  %v205_v16 = vsub.f32 %v197_v10, %v201_v11  ;;  %v199_v17 = vmul.f32 0.03125, %v191_v14  ;;  %v198_v18 = vmul.f32 0.03125, %v188_v15 }
 0x190   :  { %v209_v19 = vmax.f32 %v205_v16, 0.0  ;;  %v207_v20 = vsub.f32 %v199_v17, %v203_v13  ;;  %v206_v21 = vsub.f32 %v198_v18, %v202_v12 }
 0x192   :  { %v217_v22 = vadd.f32 1e-05, %v209_v19  ;;  %v211_v23 = vmax.f32 %v207_v20, 0.0  ;;  %v210_v24 = vmax.f32 %v206_v21, 0.0 }
 0x194   :  { %334 = vrsqrt.f32 %v217_v22  ;;  %v219_v25 = vadd.f32 1e-05, %v211_v23  ;;  %v218_v26 = vadd.f32 1e-05, %v210_v24 }
 0x196   :  { %336 = vrsqrt.f32 %v219_v25 }
 0x197   :  { %338 = vrsqrt.f32 %v218_v26 }
 0x19b   :  { %v333_v28 = vpop.eup %332 }
 0x19c   :  { %v224_v30 = vmul.f32 %v333_v28, %v212_v27 }
 0x19e   :  { %v235_v32 = vmul.f32 %v276_v29, %v224_v30 }
 0x1a0   :  { %v246_v33 = vadd.f32 %v277_v31, %v235_v32 }
 0x1a1   :  { %v335_v35 = vpop.eup %334 }
 0x1a2   :  { %v225_v39 = vmul.f32 %v335_v35, %v213_v34  ;;  %250 = vst.msk [vmem:[#allocation2] sm:$0xff] %vm163_vm2, %v246_v33 }
 0x1a3   :  { %v337_v37 = vpop.eup %336 }
 0x1a4   :  { %v339_v41 = vpop.eup %338  ;;  %v236_v42 = vmul.f32 %v276_v29, %v225_v39  ;;  %v227_v43 = vmul.f32 %v337_v37, %v215_v36 }
 0x1a5   :  { %v226_v44 = vmul.f32 %v339_v41, %v214_v40 }
 0x1a6   :  { %v247_v45 = vadd.f32 %v277_v31, %v236_v42  ;;  %v238_v48 = vmul.f32 %v276_v29, %v227_v43 }
 0x1a7   :  { %v237_v49 = vmul.f32 %v276_v29, %v226_v44 }
 0x1a8   :  { %251 = vst.msk [vmem:[#allocation2 + $0x8] sm:$0xff] %vm163_vm2, %v247_v45  ;;  %v249_v47 = vadd.f32 %v277_v31, %v238_v48 }
 0x1a9   :  { %v248_v46 = vadd.f32 %v277_v31, %v237_v49 }
 0x1aa   :  { %253 = vst.msk [vmem:[#allocation2 + $0x18] sm:$0xff] %vm163_vm2, %v249_v47 }
 0x1ab   :  { %252 = vst.msk [vmem:[#allocation2 + $0x10] sm:$0xff] %vm163_vm2, %v248_v46 }
 0x1ac   :  { %351 = shalt.err (!%p348_p4)
}
 0x1ad   :  { %s364_s13 = smov 128   ;;  %s365_s14 = smov 8  }
 0x1ae   :  { %265 = dma.vmem_to_hbm [thread:$0]  %s260_s12, 512, %s598_s5, [#allocation3], %s364_s13, %s364_s13, %s365_s14  }
 0x1af   :  { %360 = dma.done.wait [#allocation3], 512  }
 0x1b0   :  { %361 = vsyncadd [#allocation3], 4294966784 }
 0x1b1   :  { %269 = vsyncpa [#allocation3], 1 }

</bundles_post_ra>
